<compile_context>
chip_gen: v7x
topology: tpu7x:2x2x1
jax: 0.10.0
libtpu: 0.0.40
codegen_flags: <defaults>
</compile_context>

<pallas_src>
import jax
import jax.numpy as jnp
from jax.experimental import pallas as pl
from jax.experimental.pallas import tpu as pltpu

EPS = 1e-5
IN_F = 64
HID_F = 16
OUT_F = 3
LANE_PAD = 128            # lane-dense output width


def _round_up(n, m):
    return ((n + m - 1) // m) * m


# ---------------------------------------------------------------------------
# Kernel: one fused affine map  o = inp @ W_eff + b_eff   (W_eff lane-padded)
# ---------------------------------------------------------------------------
def _affine_kernel(x_ref, w_ref, b_ref, o_ref):
    # x: (TILE_N, 64) f32, w: (64, 128) f32, b: (1, 128) f32, o: (TILE_N, 128)
    o_ref[...] = (
        jnp.dot(x_ref[...], w_ref[...], preferred_element_type=jnp.float32)
        + b_ref[...]
    )


def _run_affine(xin, w_eff_pad, b_eff_pad, *, tile_n=1024):
    """Runs the fused affine map on an (N, 64) input, returns (N, 3)."""
    N = xin.shape[0]
    # Tile the batch dim; small batches use a single (8-row-aligned) tile.
    tn = min(tile_n, _round_up(N, 8))
    n_pad = _round_up(N, tn)
    if n_pad != N:
        xin = jnp.pad(xin, ((0, n_pad - N), (0, 0)))
    grid = (n_pad // tn,)

    out = pl.pallas_call(
        _affine_kernel,
        out_shape=jax.ShapeDtypeStruct((n_pad, LANE_PAD), jnp.float32),
        grid_spec=pltpu.PrefetchScalarGridSpec(
            num_scalar_prefetch=0,
            grid=grid,
            in_specs=[
                pl.BlockSpec((tn, IN_F), lambda i: (i, 0)),        # input tile
                pl.BlockSpec((IN_F, LANE_PAD), lambda i: (0, 0)),  # W_eff (resident)
                pl.BlockSpec((1, LANE_PAD), lambda i: (0, 0)),     # b_eff (resident)
            ],
            out_specs=pl.BlockSpec((tn, LANE_PAD), lambda i: (i, 0)),
        ),
        compiler_params=pltpu.CompilerParams(
            dimension_semantics=("parallel",),
        ),
    )(xin, w_eff_pad, b_eff_pad)

    return out[:N, :OUT_F]


def model_forward(x, y, w_eff_pad, b_eff_pad, *, tile_n=1024):
    """Equivalent of Model.forward(x, y): one kernel launch for both inputs."""
    nx = x.shape[0]
    both = jnp.concatenate([x, y], axis=0)
    out = _run_affine(both, w_eff_pad, b_eff_pad, tile_n=tile_n)
    return out[:nx], out[nx:]


# ---------------------------------------------------------------------------
# Host-side parameter construction + BN folding
# ---------------------------------------------------------------------------
def make_params():
    """Deterministic synthetic parameters (matching the module's shapes)."""
    key = jax.random.PRNGKey(42)
    ks = jax.random.split(key, 11)

    # linear_0: weight (16, 64), no bias
    w0 = jax.random.normal(ks[0], (HID_F, IN_F), jnp.float32) * 0.1
    # linear_1: weight (3, 16), bias (3,)
    w1 = jax.random.normal(ks[1], (OUT_F, HID_F), jnp.float32) * 0.1
    bias1 = jax.random.normal(ks[2], (OUT_F,), jnp.float32) * 0.1

    # bn_0: gamma, beta, running_mean (16,), running_var (16,) > 0
    g0 = jax.random.normal(ks[3], (HID_F,), jnp.float32) * 0.1 + 1.0
    b0 = jax.random.normal(ks[4], (HID_F,), jnp.float32) * 0.1
    m0 = jax.random.normal(ks[5], (HID_F,), jnp.float32) * 0.1
    v0 = jax.random.uniform(ks[6], (HID_F,), jnp.float32, 0.5, 1.5)

    # bn_1: gamma, beta, running_mean (3,), running_var (3,) > 0
    g1 = jax.random.normal(ks[7], (OUT_F,), jnp.float32) * 0.1 + 1.0
    b1 = jax.random.normal(ks[8], (OUT_F,), jnp.float32) * 0.1
    m1 = jax.random.normal(ks[9], (OUT_F,), jnp.float32) * 0.1
    v1 = jax.random.uniform(ks[10], (OUT_F,), jnp.float32, 0.5, 1.5)

    return dict(w0=w0, w1=w1, bias1=bias1,
                g0=g0, b0=b0, m0=m0, v0=v0,
                g1=g1, b1=b1, m1=m1, v1=v1)


def fold_params(p):
    """Fold both BNs into the Linears, then collapse the affine chain.

    Returns lane-padded (64, 128) W_eff and (1, 128) b_eff.
    """
    # BN0 folded into linear_0 (no bias):  h = x @ (W0t * s0) + (beta0 - m0*s0)
    s0 = p["g0"] / jnp.sqrt(p["v0"] + EPS)                 # (16,)
    w0f = p["w0"].T * s0[None, :]                          # (64, 16)
    b0f = p["b0"] - p["m0"] * s0                           # (16,)

    # BN1 folded into linear_1:  z = h @ (W1t * s1) + ((bias1 - m1)*s1 + beta1)
    s1 = p["g1"] / jnp.sqrt(p["v1"] + EPS)                 # (3,)
    w1f = p["w1"].T * s1[None, :]                          # (16, 3)
    b1f = (p["bias1"] - p["m1"]) * s1 + p["b1"]            # (3,)

    # Collapse: out = x @ (w0f @ w1f) + (b0f @ w1f + b1f)
    w_eff = w0f @ w1f                                      # (64, 3)
    b_eff = b0f @ w1f + b1f                                # (3,)

    # Lane-dense padding to 128 output columns (zero-filled).
    w_eff_pad = jnp.zeros((IN_F, LANE_PAD), jnp.float32).at[:, :OUT_F].set(w_eff)
    b_eff_pad = jnp.zeros((1, LANE_PAD), jnp.float32).at[0, :OUT_F].set(b_eff)
    return w_eff_pad, b_eff_pad


def reference(x, p):
    """Pure-JAX reference of the unfused eval-mode forward."""
    h = x @ p["w0"].T
    h = (h - p["m0"]) / jnp.sqrt(p["v0"] + EPS) * p["g0"] + p["b0"]
    z = h @ p["w1"].T + p["bias1"]
    z = (z - p["m1"]) / jnp.sqrt(p["v1"] + EPS) * p["g1"] + p["b1"]
    return z


if __name__ == "__main__":
    params = make_params()
    w_eff_pad, b_eff_pad = fold_params(params)

    key = jax.random.PRNGKey(0)
    kx, ky = jax.random.split(key)
    x = jax.random.uniform(kx, (8, IN_F), jnp.float32)     # first input
    y = jax.random.uniform(ky, (16, IN_F), jnp.float32)    # second input

    out_x, out_y = model_forward(x, y, w_eff_pad, b_eff_pad)
    jax.block_until_ready((out_x, out_y))

    ref_x = reference(x, params)
    ref_y = reference(y, params)

    assert out_x.shape == (8, OUT_F) and out_y.shape == (16, OUT_F)
    assert jnp.allclose(out_x, ref_x, atol=1e-4, rtol=1e-4)
    assert jnp.allclose(out_y, ref_y, atol=1e-4, rtol=1e-4)

    print("KERNEL_OK")
</pallas_src>

<mosaic_0001>
module attributes {stable_mosaic.version = 11 : i64} {
  func.func @_affine_kernel(%arg0: i32, %arg1: memref<24x64xf32, #tpu.memory_space<vmem>>, %arg2: memref<64x128xf32, #tpu.memory_space<vmem>>, %arg3: memref<1x128xf32, #tpu.memory_space<vmem>>, %arg4: memref<24x128xf32, #tpu.memory_space<vmem>>) attributes {dimension_semantics = [#tpu.dimension_semantics<parallel>], iteration_bounds = array<i64: 1>, scalar_prefetch = 0 : i64, scratch_operands = 0 : i64, tpu.core_type = #tpu.core_type<tc>, window_params = [{transform_indices = @transform_0, window_bounds = array<i64: 24, 64>}, {pipeline_mode = #tpu.pipeline_mode<synchronous>, transform_indices = @transform_1, window_bounds = array<i64: 64, 128>}, {pipeline_mode = #tpu.pipeline_mode<synchronous>, transform_indices = @transform_2, window_bounds = array<i64: 1, 128>}, {transform_indices = @transform_3, window_bounds = array<i64: 24, 128>}]} {
    %c0 = arith.constant 0 : index
    %c0_0 = arith.constant 0 : index
    %0 = vector.load %arg1[%c0, %c0_0] : memref<24x64xf32, #tpu.memory_space<vmem>>, vector<24x64xf32>
    %c0_1 = arith.constant 0 : index
    %c0_2 = arith.constant 0 : index
    %1 = vector.load %arg2[%c0_1, %c0_2] : memref<64x128xf32, #tpu.memory_space<vmem>>, vector<64x128xf32>
    %cst = arith.constant dense<0.000000e+00> : vector<24x128xf32>
    %2 = tpu.matmul %0, %1, %cst {dimension_numbers = #tpu.dot_dimension_numbers<[1], [0], [0], [1], [0, 0, 1, 1], [], []>} : vector<24x64xf32>, vector<64x128xf32>, vector<24x128xf32> -> vector<24x128xf32>
    %c0_3 = arith.constant 0 : index
    %c0_4 = arith.constant 0 : index
    %3 = vector.load %arg3[%c0_3, %c0_4] : memref<1x128xf32, #tpu.memory_space<vmem>>, vector<1x128xf32>
    %4 = vector.broadcast %3 : vector<1x128xf32> to vector<24x128xf32>
    %5 = arith.addf %2, %4 : vector<24x128xf32>
    %c0_5 = arith.constant 0 : index
    %c0_6 = arith.constant 0 : index
    %6 = vector.load %arg4[%c0_5, %c0_6] : memref<24x128xf32, #tpu.memory_space<vmem>>, vector<24x128xf32>
    tpu.vector_store %arg4[%c0_5, %c0_6], %5 {strides = array<i32>} : memref<24x128xf32, #tpu.memory_space<vmem>>, vector<24x128xf32>,
    return
  }
  func.func @transform_0(%arg0: i32) -> (i32, i32) {
    %c0_i32 = arith.constant 0 : i32
    %c0_i32_0 = arith.constant 0 : i32
    return %arg0, %c0_i32 : i32, i32
  }
  func.func @transform_1(%arg0: i32) -> (i32, i32) {
    %c0_i32 = arith.constant 0 : i32
    %c0_i32_0 = arith.constant 0 : i32
    %c0_i32_1 = arith.constant 0 : i32
    return %c0_i32, %c0_i32_0 : i32, i32
  }
  func.func @transform_2(%arg0: i32) -> (i32, i32) {
    %c0_i32 = arith.constant 0 : i32
    %c0_i32_0 = arith.constant 0 : i32
    %c0_i32_1 = arith.constant 0 : i32
    return %c0_i32, %c0_i32_0 : i32, i32
  }
  func.func @transform_3(%arg0: i32) -> (i32, i32) {
    %c0_i32 = arith.constant 0 : i32
    %c0_i32_0 = arith.constant 0 : i32
    return %arg0, %c0_i32 : i32, i32
  }
}

</mosaic_0001>

<bundles_post_ra>
// kernel: tpu_custom_call.1
= control target key start
LH: loop header
LB: loop body
LE: loop exit
PB: predicated region body
PF: predicated region fallthrough
CT: control target
= control target key end

     0   :  { %8 = vsyncpa [#allocation3], 0  ;;  %s391_s0 = inlined_call_operand.hbm [shape: f32[24,64], index: 0, kind: input, shape index: {}]   ;;  %s392_s1 = inlined_call_operand.hbm [shape: f32[64,128], index: 1, kind: input, shape index: {}]   ;;  %s393_s2 = inlined_call_operand.vmem [shape: f32[1,128], index: 2, kind: input, shape index: {}]   ;;  %s394_s3 = inlined_call_operand.hbm [shape: f32[24,128], index: 3, kind: output, shape index: {}]  }
   0x1   :  { %9 = vsyncpa [#allocation6], 0 }
   0x2   :  { %10 = vsyncpa [#allocation4], 0  ;;  %s312_s12 = smov [#allocation2]   ;;  %s240_s16 = scalar_lea.hbm %s391_s0, 384 }
   0x3   :  { %s16_s13 = sshll.u32 %s312_s12, 4  ;;  %p241_p0 = scmp.ne.s32.totalorder %s391_s0, %s240_s16  ;;  %s17_s13 = int_to_ptr.vmem [resolvable:$true] %s16_s13 }
   0x4   :  { %p244_p1 = scmp.lt.u32.totalorder %s240_s16, %s391_s0 }
   0x6   :  { %p246_p2 = pnand %p244_p1, %p241_p0 }
   0x8   :  { %249 = shalt.err (!%p246_p2)
}
   0x9   :  { %s250_s21 = scalar_lea.vmem %s17_s13, 384  ;;  %p255_p4 = scmp.lt.s32.totalorder %s17_s13, %s17_s13 }
   0xa   :  { %p251_p3 = scmp.ne.s32.totalorder %s17_s13, %s250_s21  ;;  %p256_p5 = scmp.lt.s32.totalorder %s250_s21, %s250_s21 }
   0xc   :  { %p257_p6 = por %p256_p5, %p255_p4 }
   0xe   :  { %p258_p7 = pnand %p257_p6, %p251_p3 }
  0x10   :  { %261 = shalt.err (!%p258_p7)
}
  0x11   :  { %s313_s22 = smov 128   ;;  %s314_s23 = smov 8  }
  0x12   :  { %22 = dma.hbm_to_vmem [thread:$0]  %s391_s0, 384, %s17_s13, [#allocation3], %s313_s22, %s313_s22, %s314_s23  }
  0x13   :  { %s315_s26 = smov [#allocation5]   ;;  %s262_s30 = scalar_lea.hbm %s392_s1, 1024 }
  0x14   :  { %s28_s27 = sshll.u32 %s315_s26, 4  ;;  %p263_p8 = scmp.ne.s32.totalorder %s392_s1, %s262_s30  ;;  %s29_s27 = int_to_ptr.vmem [resolvable:$true] %s28_s27 }
  0x15   :  { %p266_p9 = scmp.lt.u32.totalorder %s262_s30, %s392_s1 }
  0x17   :  { %p268_p10 = pnand %p266_p9, %p263_p8 }
  0x19   :  { %271 = shalt.err (!%p268_p10)
}
  0x1a   :  { %s272_s8 = scalar_lea.vmem %s29_s27, 1024  ;;  %p277_p12 = scmp.lt.s32.totalorder %s29_s27, %s29_s27 }
  0x1b   :  { %p273_p11 = scmp.ne.s32.totalorder %s29_s27, %s272_s8  ;;  %p278_p13 = scmp.lt.s32.totalorder %s272_s8, %s272_s8 }
  0x1d   :  { %p279_p0 = por %p278_p13, %p277_p12 }
  0x1f   :  { %p280_p1 = pnand %p279_p0, %p273_p11 }
  0x21   :  { %283 = shalt.err (!%p280_p1)
}
  0x22   :  { %34 = dma.hbm_to_vmem [thread:$0]  %s392_s1, 1024, %s29_s27, [#allocation6], %s313_s22, %s313_s22, %s314_s23  }
  0x23   :  { %306 = dma.done.wait [#allocation3], 384  }
  0x24   :  { %307 = vsyncadd [#allocation3], 4294966912 }
  0x25   :  { %308 = dma.done.wait [#allocation6], 1024  }
  0x26   :  { %309 = vsyncadd [#allocation6], 4294966272  ;;  %v316_v0 = vmov 0.0|0.0   ;;  %vm317_vm0 = vmmov 0   ;;  %v318_v1 = vmov 0.0   ;;  %v46_v2 = vld [vmem:[#allocation5] sm:$0xff] }
  0x27   :  { %224 = vmatprep.subr.bf16.mxu1 %v316_v0  ;;  %212 = vmatprep.subr.bf16.mxu0 %v316_v0  ;;  %v47_v3 = vld [vmem:[#allocation5 + $0x8] sm:$0xff]  ;;  %v48_v4 = vld [vmem:[#allocation5 + $0x10] sm:$0xff]  ;;  %v49_v6 = vld [vmem:[#allocation5 + $0x18] sm:$0xff]  ;;  %vm61_vm1 = vcmask 523264   ;;  %s319_s11 = smov [#allocation7]  }
  0x28   :  { %206 = vmatprep.mubr.msk.f32.mxu1 %vm317_vm0, %v318_v1  ;;  %203 = vmatprep.mubr.msk.f32.mxu0 %vm317_vm0, %v318_v1  ;;  %v213_v5 = vpack.c.bf16 %v47_v3, %v46_v2  ;;  %v216_v7 = vpack.c.bf16 %v49_v6, %v48_v4  ;;  %v50_v8 = vld [vmem:[#allocation5 + $0x20] sm:$0xff]  ;;  %v51_v9 = vld [vmem:[#allocation5 + $0x28] sm:$0xff]  ;;  %v52_v11 = vld [vmem:[#allocation5 + $0x30] sm:$0xff]  ;;  %s159_s12 = sshll.u32 %s319_s11, 4  ;;  %s160_s12 = int_to_ptr.vmem [resolvable:$true] %s159_s12 }
  0x29   :  { %v219_v10 = vpack.c.bf16 %v51_v9, %v50_v8  ;;  %v53_v12 = vld [vmem:[#allocation5 + $0x38] sm:$0xff]  ;;  %v44_v14 = vld [vmem:[#allocation2 + $0x8] sm:$0xff]  ;;  %v43_v15 = vld [vmem:[#allocation2] sm:$0xff]  ;;  %s284_s13 = scalar_lea.vmem %s160_s12, 384  ;;  %p289_p3 = scmp.lt.s32.totalorder %s160_s12, %s160_s12 }
  0x2a   :  { %228 = vmatpush3.bf16.msra.mxu1 %v213_v5  ;;  %214 = vmatpush3.bf16.msra.mxu0 %v213_v5  ;;  %v222_v13 = vpack.c.bf16 %v53_v12, %v52_v11  ;;  %v45_v16 = vld [vmem:[#allocation2 + $0x10] sm:$0xff]  ;;  %v172_v17 = vld [vmem:[%s393_s2] ss:$0 sm:$0xff]  ;;  %p285_p2 = scmp.ne.s32.totalorder %s160_s12, %s284_s13  ;;  %p290_p4 = scmp.lt.s32.totalorder %s284_s13, %s284_s13 }
  0x2b   :  { %225 = vmatprep.subr.bf16.mxu1 %v316_v0  ;;  %215 = vmatprep.subr.bf16.mxu0 %v316_v0 }
  0x2c   :  { %p291_p5 = por %p290_p4, %p289_p3 }
  0x2e   :  { %229 = vmatpush3.bf16.msra.mxu1 %v216_v7  ;;  %217 = vmatpush3.bf16.msra.mxu0 %v216_v7  ;;  %p292_p6 = pnand %p291_p5, %p285_p2 }
  0x2f   :  { %226 = vmatprep.subr.bf16.mxu1 %v316_v0  ;;  %218 = vmatprep.subr.bf16.mxu0 %v316_v0 }
  0x32   :  { %230 = vmatpush3.bf16.msra.mxu1 %v219_v10  ;;  %220 = vmatpush3.bf16.msra.mxu0 %v219_v10 }
  0x33   :  { %227 = vmatprep.subr.bf16.mxu1 %v316_v0  ;;  %221 = vmatprep.subr.bf16.mxu0 %v316_v0 }
  0x36   :  { %231 = vmatpush3.bf16.msra.mxu1 %v222_v13  ;;  %223 = vmatpush3.bf16.msra.mxu0 %v222_v13 }
  0x39   :  { %207 = vmatmul.mubr.msk.f32.vlgmr.msra.gmra.mrb[0].mxu1 %vm61_vm1, %v44_v14  ;;  %204 = vmatmul.mubr.msk.f32.vlgmr.msra.gmra.mrb[0].mxu0 %vm61_vm1, %v43_v15 }
  0x3a   :  { %209 = vmatprep.mubr.msk.f32.mxu1 %vm317_vm0, %v318_v1 }
  0x3d   :  { %210 = vmatmul.mubr.msk.f32.gmra.mrb[2].mxu1 %vm61_vm1, %v45_v16 }
 0x10c   :  { %v142_v18 = vpop.f32.mrb[0].mxu1  ;;  %v137_v19 = vpop.f32.mrb[0].mxu0 }
 0x10d   :  { %v143_v20 = vadd.f32 %v172_v17, %v142_v18  ;;  %v208_v21 = vpop.f32.mrb[1].mxu1  ;;  %v138_v22 = vadd.f32 %v172_v17, %v137_v19  ;;  %v205_v23 = vpop.f32.mrb[1].mxu0 }
 0x10f   :  { %152 = vst [vmem:[#allocation7 + $0x8] sm:$0xff] %v143_v20  ;;  %151 = vst [vmem:[#allocation7] sm:$0xff] %v138_v22 }
 0x110   :  { %v147_v24 = vpop.f32.mrb[2].mxu1 }
 0x111   :  { %v148_v25 = vadd.f32 %v172_v17, %v147_v24  ;;  %v211_v26 = vpop.f32.mrb[3].mxu1 }
 0x113   :  { %153 = vst [vmem:[#allocation7 + $0x10] sm:$0xff] %v148_v25 }
 0x114   :  { %295 = shalt.err (!%p292_p6)
}
 0x115   :  { %s296_s15 = scalar_lea.hbm %s394_s3, 384 }
 0x116   :  { %p297_p7 = scmp.ne.s32.totalorder %s394_s3, %s296_s15  ;;  %p300_p8 = scmp.lt.u32.totalorder %s296_s15, %s394_s3 }
 0x118   :  { %p302_p9 = pnand %p300_p8, %p297_p7 }
 0x11a   :  { %305 = shalt.err (!%p302_p9)
}
 0x11b   :  { %165 = dma.vmem_to_hbm [thread:$0]  %s160_s12, 384, %s394_s3, [#allocation4], %s313_s22, %s313_s22, %s314_s23  }
 0x11c   :  { %310 = dma.done.wait [#allocation4], 384  }
 0x11d   :  { %311 = vsyncadd [#allocation4], 4294966912 }
 0x11e   :  { %169 = vsyncpa [#allocation3], 1 }
 0x11f   :  { %170 = vsyncpa [#allocation6], 1 }
 0x120   :  { %171 = vsyncpa [#allocation4], 1 }

</bundles_post_ra>
